<compile_context>
chip_gen: v7x
topology: tpu7x:2x2x1
jax: 0.10.0
libtpu: 0.0.40
codegen_flags: <defaults>
</compile_context>

<pallas_src>
import math

import jax
import jax.numpy as jnp
from jax.experimental import pallas as pl
from jax.experimental.pallas import tpu as pltpu

_INV_SQRT2 = 1.0 / math.sqrt(2.0)


def _round_up(x, m):
    return ((x + m - 1) // m) * m


# ----------------------------------------------------------------------------
# Generation detection (cheap, cached) — used only for tile / VMEM heuristics.
# ----------------------------------------------------------------------------
_DEVICE_KIND = None


def _device_kind():
    global _DEVICE_KIND
    if _DEVICE_KIND is None:
        try:
            _DEVICE_KIND = jax.devices()[0].device_kind.lower()
        except Exception:  # pragma: no cover - defensive
            _DEVICE_KIND = ""
    return _DEVICE_KIND


def _is_v7():
    return "v7" in _device_kind()


def _num_tensorcores():
    return 2 if _is_v7() else 1


def _vmem_limit_bytes():
    # ~75% of physical per-TC VMEM: 48 MiB on v7x (64 MiB/TC), 96 MiB on
    # v5e/v6e (128 MiB).  Leaves headroom for compiler-internal scratch.
    return (48 if _is_v7() else 96) * 1024 * 1024


def _default_row_tile():
    return 256 if _is_v7() else 512


def _default_h_chunk():
    return 1024 if _is_v7() else 2048


def _pick_row_tile(M, tm_req=None):
    """Pick a row tile that feeds the MXU but minimizes M over-padding."""
    if tm_req is None:
        tm_req = _default_row_tile()
    tm_req = max(8, _round_up(min(tm_req, _round_up(M, 8)), 8))
    candidates = [c for c in (512, 384, 256, 128) if c <= tm_req]
    if tm_req not in candidates:
        candidates.insert(0, tm_req)
    # Minimize wasted zero rows; tie-break toward the larger tile.
    best = min(candidates, key=lambda c: (_round_up(M, c) - M, -c))
    m_p = _round_up(M, best)
    # On 2-TC chips keep >= 2 row tiles when possible so the "parallel" axis
    # can split across cores.
    if _num_tensorcores() >= 2 and m_p // best < 2 and best >= 256:
        best //= 2
        m_p = _round_up(M, best)
    return best, m_p


# ----------------------------------------------------------------------------
# Kernel: grid = (row tiles, hidden-dim chunks)
#   x:  (tm, D_in_p)   bf16      (fetched once per row tile; reused across j)
#   W1: (D_in_p, th)   bf16      b1: (1, th)      f32
#   W2: (th, D_out_p)  bf16      b2: (1, D_out_p) f32
#   acc scratch: (tm, D_out_p) f32, accumulated over the hidden-chunk axis.
# ----------------------------------------------------------------------------
def _ffn_kernel(x_ref, w1_ref, b1_ref, w2_ref, b2_ref, o_ref, acc_ref):
    j = pl.program_id(1)

    @pl.when(j == 0)
    def _():
        acc_ref[...] = jnp.zeros_like(acc_ref)

    # First linear chunk: (tm, D_in) @ (D_in, th), bf16 in, f32 accumulate.
    h = jnp.dot(x_ref[...], w1_ref[...], preferred_element_type=jnp.float32)
    h = h + b1_ref[...]
    # Exact GELU (matches torch.nn.GELU() default, erf-based), f32 on EUP/VPU.
    h = 0.5 * h * (1.0 + jax.lax.erf(h * _INV_SQRT2))
    # Dropout: identity (inference mode).
    # Second linear chunk: (tm, th) @ (th, D_out) accumulated into f32 scratch.
    acc_ref[...] += jnp.dot(h.astype(jnp.bfloat16), w2_ref[...],
                            preferred_element_type=jnp.float32)

    @pl.when(j == pl.num_programs(1) - 1)
    def _():
        o_ref[...] = (acc_ref[...] + b2_ref[...]).astype(o_ref.dtype)


# ----------------------------------------------------------------------------
# One-time parameter preparation (pad to lane-dense multiples of 128, choose a
# hidden-dim chunk that divides the padded hidden size, cast weights to bf16).
# Keep the returned dict around; do NOT redo this per forward call.
# ----------------------------------------------------------------------------
def prepare_ffn_params(w1, b1, w2, b2, *, h_chunk=None):
    D_in, H = w1.shape
    D_out = w2.shape[1]
    if h_chunk is None:
        h_chunk = _default_h_chunk()
    h_chunk = _round_up(h_chunk, 128)

    th = min(_round_up(H, 128), h_chunk)
    H_p = _round_up(H, th)              # th divides H_p by construction
    D_in_p = _round_up(D_in, 128)
    D_out_p = _round_up(D_out, 128)

    # Zero padding is exact: padded x cols x padded W1 rows are zero, padded h
    # cols hit zero W2 rows, padded b2 entries are zero (and sliced off anyway).
    w1_p = jnp.pad(w1, ((0, D_in_p - D_in), (0, H_p - H))).astype(jnp.bfloat16)
    b1_p = jnp.pad(b1, (0, H_p - H)).reshape(1, H_p).astype(jnp.float32)
    w2_p = jnp.pad(w2, ((0, H_p - H), (0, D_out_p - D_out))).astype(jnp.bfloat16)
    b2_p = jnp.pad(b2, (0, D_out_p - D_out)).reshape(1, D_out_p).astype(jnp.float32)

    return dict(w1=w1_p, b1=b1_p, w2=w2_p, b2=b2_p,
                d_in=D_in, d_out=D_out, th=th)


def positionwise_ffn(x, params, *, tm=None):
    """x: [..., D_in] -> [..., D_out] using prepared (padded, bf16) params."""
    w1_p, b1_p = params["w1"], params["b1"]
    w2_p, b2_p = params["w2"], params["b2"]
    D_in, D_out, th = params["d_in"], params["d_out"], params["th"]
    D_in_p, H_p = w1_p.shape
    D_out_p = w2_p.shape[1]
    assert x.shape[-1] == D_in

    lead_shape = x.shape[:-1]
    M = int(math.prod(lead_shape)) if lead_shape else 1
    tm, M_p = _pick_row_tile(M, tm)

    x2d = x.reshape(M, D_in)
    if (M_p - M) or (D_in_p - D_in):
        x2d = jnp.pad(x2d, ((0, M_p - M), (0, D_in_p - D_in)))
    x2d = x2d.astype(jnp.bfloat16)      # fused with the pad copy; halves x DMA

    n_m = M_p // tm
    n_h = H_p // th
    grid = (n_m, n_h)

    # Constant-indexed blocks get a single buffer; chunk-streamed weights keep
    # the default double buffer so the next chunk's DMA overlaps compute.
    def _spec(shape, index_map, single_buffer):
        if single_buffer:
            return pl.BlockSpec(shape, index_map, pipeline_mode=pl.Buffered(1))
        return pl.BlockSpec(shape, index_map)

    weights_const = (n_h == 1)

    cost = pl.CostEstimate(
        flops=2 * M_p * (D_in_p * H_p + H_p * D_out_p),
        transcendentals=M_p * H_p,                      # erf
        bytes_accessed=(x2d.size * 2
                        + n_m * (w1_p.size * 2 + w2_p.size * 2
                                 + b1_p.size * 4 + b2_p.size * 4)
                        + M_p * D_out_p * 4),
    )

    out2d = pl.pallas_call(
        _ffn_kernel,
        out_shape=jax.ShapeDtypeStruct((M_p, D_out_p), x.dtype),
        grid_spec=pltpu.PrefetchScalarGridSpec(
            num_scalar_prefetch=0,
            grid=grid,
            in_specs=[
                # x row tile: constant across j -> fetched once per row tile.
                pl.BlockSpec((tm, D_in_p), lambda i, j: (i, 0)),
                _spec((D_in_p, th), lambda i, j: (0, j), weights_const),   # W1
                _spec((1, th), lambda i, j: (0, j), weights_const),        # b1
                _spec((th, D_out_p), lambda i, j: (j, 0), weights_const),  # W2
                _spec((1, D_out_p), lambda i, j: (0, 0), True),            # b2
            ],
            out_specs=pl.BlockSpec((tm, D_out_p), lambda i, j: (i, 0)),
            scratch_shapes=[pltpu.VMEM((tm, D_out_p), jnp.float32)],
        ),
        compiler_params=pltpu.CompilerParams(
            dimension_semantics=("parallel", "arbitrary"),
            vmem_limit_bytes=_vmem_limit_bytes(),
        ),
        cost_estimate=cost,
    )(x2d, w1_p, b1_p, w2_p, b2_p)

    if (M_p - M) or (D_out_p - D_out):
        out2d = out2d[:M, :D_out]
    return out2d.reshape(*lead_shape, D_out)


# ----------------------------------------------------------------------------
# Init + references + self-test
# ----------------------------------------------------------------------------
def _init_params(key, hidden_dim, pf_dim):
    """Deterministic init mimicking nn.Linear's uniform(-1/sqrt(fan_in)) ranges."""
    k1, k2, k3, k4 = jax.random.split(key, 4)
    lim1 = 1.0 / math.sqrt(hidden_dim)
    lim2 = 1.0 / math.sqrt(pf_dim)
    # Stored as (in, out) so the kernel does x @ W directly.
    w1 = jax.random.uniform(k1, (hidden_dim, pf_dim), jnp.float32, -lim1, lim1)
    b1 = jax.random.uniform(k2, (pf_dim,), jnp.float32, -lim1, lim1)
    w2 = jax.random.uniform(k3, (pf_dim, hidden_dim), jnp.float32, -lim2, lim2)
    b2 = jax.random.uniform(k4, (hidden_dim,), jnp.float32, -lim2, lim2)
    return w1, b1, w2, b2


def _gelu(h):
    return 0.5 * h * (1.0 + jax.lax.erf(h * _INV_SQRT2))


def _reference_f32(x, w1, b1, w2, b2):
    h = _gelu(x @ w1 + b1)
    return h @ w2 + b2


def _reference_bf16(x, w1, b1, w2, b2):
    """Same numerics as the kernel: bf16 matmul inputs, f32 accumulate/elementwise."""
    h = jnp.dot(x.astype(jnp.bfloat16), w1.astype(jnp.bfloat16),
                preferred_element_type=jnp.float32) + b1
    h = _gelu(h)
    y = jnp.dot(h.astype(jnp.bfloat16), w2.astype(jnp.bfloat16),
                preferred_element_type=jnp.float32) + b2
    return y


if __name__ == "__main__":
    # Small shapes consistent with the module's forward: [batch, seq, hidden_dim]
    B, S = 2, 8
    hidden_dim, pf_dim = 32, 64
    dropout_ratio = 0.1    # inactive (inference mode)

    key = jax.random.PRNGKey(0)
    kx, kp = jax.random.split(key)
    x = jax.random.normal(kx, (B, S, hidden_dim), jnp.float32)
    w1, b1, w2, b2 = _init_params(kp, hidden_dim, pf_dim)

    params = prepare_ffn_params(w1, b1, w2, b2)   # one-time pad + bf16 cast
    out = positionwise_ffn(x, params)
    out = jax.block_until_ready(out)
    assert out.shape == (B, S, hidden_dim)

    # Tight check against a reference with matched (bf16-matmul) precision.
    ref_bf16 = _reference_bf16(x, w1, b1, w2, b2)
    assert jnp.allclose(out, ref_bf16, atol=1e-3, rtol=1e-3), "mismatch vs bf16 reference"

    # Loose sanity check against the exact f32 reference.
    ref_f32 = _reference_f32(x, w1, b1, w2, b2)
    assert jnp.allclose(out, ref_f32, atol=1e-1), "mismatch vs f32 reference"

    print("KERNEL_OK")
</pallas_src>

<mosaic_0001>
module attributes {stable_mosaic.version = 11 : i64} {
  func.func @_ffn_kernel(%arg0: i32, %arg1: i32, %arg2: memref<16x128xbf16, #tpu.memory_space<vmem>>, %arg3: memref<128x128xbf16, #tpu.memory_space<vmem>>, %arg4: memref<1x128xf32, #tpu.memory_space<vmem>>, %arg5: memref<128x128xbf16, #tpu.memory_space<vmem>>, %arg6: memref<1x128xf32, #tpu.memory_space<vmem>>, %arg7: memref<16x128xf32, #tpu.memory_space<vmem>>, %arg8: memref<16x128xf32, #tpu.memory_space<vmem>>) attributes {dimension_semantics = [#tpu.dimension_semantics<parallel>, #tpu.dimension_semantics<arbitrary>], iteration_bounds = array<i64: 1, 1>, scalar_prefetch = 0 : i64, scratch_operands = 1 : i64, tpu.core_type = #tpu.core_type<tc>, window_params = [{transform_indices = @transform_0, window_bounds = array<i64: 16, 128>}, {pipeline_mode = #tpu.pipeline_mode<synchronous>, transform_indices = @transform_1, window_bounds = array<i64: 128, 128>}, {pipeline_mode = #tpu.pipeline_mode<synchronous>, transform_indices = @transform_2, window_bounds = array<i64: 1, 128>}, {pipeline_mode = #tpu.pipeline_mode<synchronous>, transform_indices = @transform_3, window_bounds = array<i64: 128, 128>}, {pipeline_mode = #tpu.pipeline_mode<synchronous>, transform_indices = @transform_4, window_bounds = array<i64: 1, 128>}, {transform_indices = @transform_5, window_bounds = array<i64: 16, 128>}]} {
    %c0_i32 = arith.constant 0 : i32
    %0 = arith.cmpi eq, %arg1, %c0_i32 : i32
    %1 = arith.extui %0 : i1 to i32
    %c0_i32_0 = arith.constant 0 : i32
    %2 = arith.cmpi ne, %1, %c0_i32_0 : i32
    scf.if %2 {
      %cst_18 = arith.constant 0.000000e+00 : f32
      %26 = vector.broadcast %cst_18 : f32 to vector<16x128xf32>
      %c0_19 = arith.constant 0 : index
      %c0_20 = arith.constant 0 : index
      %27 = vector.load %arg8[%c0_19, %c0_20] : memref<16x128xf32, #tpu.memory_space<vmem>>, vector<16x128xf32>
      tpu.vector_store %arg8[%c0_19, %c0_20], %26 {strides = array<i32>} : memref<16x128xf32, #tpu.memory_space<vmem>>, vector<16x128xf32>,
    } else {
    }
    %c0 = arith.constant 0 : index
    %c0_1 = arith.constant 0 : index
    %3 = vector.load %arg2[%c0, %c0_1] : memref<16x128xbf16, #tpu.memory_space<vmem>>, vector<16x128xbf16>
    %c0_2 = arith.constant 0 : index
    %c0_3 = arith.constant 0 : index
    %4 = vector.load %arg3[%c0_2, %c0_3] : memref<128x128xbf16, #tpu.memory_space<vmem>>, vector<128x128xbf16>
    %cst = arith.constant dense<0.000000e+00> : vector<16x128xf32>
    %5 = tpu.matmul %3, %4, %cst {dimension_numbers = #tpu.dot_dimension_numbers<[1], [0], [0], [1], [0, 0, 1, 1], [], []>} : vector<16x128xbf16>, vector<128x128xbf16>, vector<16x128xf32> -> vector<16x128xf32>
    %c0_4 = arith.constant 0 : index
    %c0_5 = arith.constant 0 : index
    %6 = vector.load %arg4[%c0_4, %c0_5] : memref<1x128xf32, #tpu.memory_space<vmem>>, vector<1x128xf32>
    %7 = vector.broadcast %6 : vector<1x128xf32> to vector<16x128xf32>
    %8 = arith.addf %5, %7 : vector<16x128xf32>
    %cst_6 = arith.constant 5.000000e-01 : f32
    %9 = vector.broadcast %cst_6 : f32 to vector<16x128xf32>
    %10 = arith.mulf %9, %8 : vector<16x128xf32>
    %cst_7 = arith.constant 0.707106769 : f32
    %11 = vector.broadcast %cst_7 : f32 to vector<16x128xf32>
    %12 = arith.mulf %8, %11 : vector<16x128xf32>
    %13 = math.erf %12 : vector<16x128xf32>
    %cst_8 = arith.constant 1.000000e+00 : f32
    %14 = vector.broadcast %cst_8 : f32 to vector<16x128xf32>
    %15 = arith.addf %14, %13 : vector<16x128xf32>
    %16 = arith.mulf %10, %15 : vector<16x128xf32>
    %c0_9 = arith.constant 0 : index
    %c0_10 = arith.constant 0 : index
    %17 = vector.load %arg8[%c0_9, %c0_10] : memref<16x128xf32, #tpu.memory_space<vmem>>, vector<16x128xf32>
    %18 = arith.truncf %16 : vector<16x128xf32> to vector<16x128xbf16>
    %c0_11 = arith.constant 0 : index
    %c0_12 = arith.constant 0 : index
    %19 = vector.load %arg5[%c0_11, %c0_12] : memref<128x128xbf16, #tpu.memory_space<vmem>>, vector<128x128xbf16>
    %cst_13 = arith.constant dense<0.000000e+00> : vector<16x128xf32>
    %20 = tpu.matmul %18, %19, %cst_13 {dimension_numbers = #tpu.dot_dimension_numbers<[1], [0], [0], [1], [0, 0, 1, 1], [], []>} : vector<16x128xbf16>, vector<128x128xbf16>, vector<16x128xf32> -> vector<16x128xf32>
    %21 = arith.addf %17, %20 : vector<16x128xf32>
    %c0_14 = arith.constant 0 : index
    %c0_15 = arith.constant 0 : index
    %22 = vector.load %arg8[%c0_14, %c0_15] : memref<16x128xf32, #tpu.memory_space<vmem>>, vector<16x128xf32>
    tpu.vector_store %arg8[%c0_14, %c0_15], %21 {strides = array<i32>} : memref<16x128xf32, #tpu.memory_space<vmem>>, vector<16x128xf32>,
    %c0_i32_16 = arith.constant 0 : i32
    %23 = arith.cmpi eq, %arg1, %c0_i32_16 : i32
    %24 = arith.extui %23 : i1 to i32
    %c0_i32_17 = arith.constant 0 : i32
    %25 = arith.cmpi ne, %24, %c0_i32_17 : i32
    scf.if %25 {
      %c0_18 = arith.constant 0 : index
      %c0_19 = arith.constant 0 : index
      %26 = vector.load %arg8[%c0_18, %c0_19] : memref<16x128xf32, #tpu.memory_space<vmem>>, vector<16x128xf32>
      %c0_20 = arith.constant 0 : index
      %c0_21 = arith.constant 0 : index
      %27 = vector.load %arg6[%c0_20, %c0_21] : memref<1x128xf32, #tpu.memory_space<vmem>>, vector<1x128xf32>
      %28 = vector.broadcast %27 : vector<1x128xf32> to vector<16x128xf32>
      %29 = arith.addf %26, %28 : vector<16x128xf32>
      %c0_22 = arith.constant 0 : index
      %c0_23 = arith.constant 0 : index
      %30 = vector.load %arg7[%c0_22, %c0_23] : memref<16x128xf32, #tpu.memory_space<vmem>>, vector<16x128xf32>
      tpu.vector_store %arg7[%c0_22, %c0_23], %29 {strides = array<i32>} : memref<16x128xf32, #tpu.memory_space<vmem>>, vector<16x128xf32>,
    } else {
    }
    return
  }
  func.func @transform_0(%arg0: i32, %arg1: i32) -> (i32, i32) {
    %c0_i32 = arith.constant 0 : i32
    %c0_i32_0 = arith.constant 0 : i32
    return %arg0, %c0_i32 : i32, i32
  }
  func.func @transform_1(%arg0: i32, %arg1: i32) -> (i32, i32) {
    %c0_i32 = arith.constant 0 : i32
    %c0_i32_0 = arith.constant 0 : i32
    return %c0_i32, %arg1 : i32, i32
  }
  func.func @transform_2(%arg0: i32, %arg1: i32) -> (i32, i32) {
    %c0_i32 = arith.constant 0 : i32
    %c0_i32_0 = arith.constant 0 : i32
    return %c0_i32, %arg1 : i32, i32
  }
  func.func @transform_3(%arg0: i32, %arg1: i32) -> (i32, i32) {
    %c0_i32 = arith.constant 0 : i32
    %c0_i32_0 = arith.constant 0 : i32
    return %arg1, %c0_i32 : i32, i32
  }
  func.func @transform_4(%arg0: i32, %arg1: i32) -> (i32, i32) {
    %c0_i32 = arith.constant 0 : i32
    %c0_i32_0 = arith.constant 0 : i32
    %c0_i32_1 = arith.constant 0 : i32
    return %c0_i32, %c0_i32_0 : i32, i32
  }
  func.func @transform_5(%arg0: i32, %arg1: i32) -> (i32, i32) {
    %c0_i32 = arith.constant 0 : i32
    %c0_i32_0 = arith.constant 0 : i32
    return %arg0, %c0_i32 : i32, i32
  }
}

</mosaic_0001>

<bundles_post_ra>
// kernel: tpu_custom_call.1
= control target key start
LH: loop header
LB: loop body
LE: loop exit
PB: predicated region body
PF: predicated region fallthrough
CT: control target
= control target key end

     0   :  { %10 = vsyncpa [#allocation4], 0  ;;  %s749_s0 = inlined_call_operand.hbm [shape: bf16[16,128], index: 0, kind: input, shape index: {}]   ;;  %s750_s1 = inlined_call_operand.hbm [shape: bf16[128,128], index: 1, kind: input, shape index: {}]   ;;  %s751_s2 = inlined_call_operand.hbm [shape: f32[1,128], index: 2, kind: input, shape index: {}]   ;;  %s752_s3 = inlined_call_operand.hbm [shape: bf16[128,128], index: 3, kind: input, shape index: {}]   ;;  %s753_s4 = inlined_call_operand.hbm [shape: f32[1,128], index: 4, kind: input, shape index: {}]   ;;  %s754_s5 = inlined_call_operand.hbm [shape: f32[16,128], index: 5, kind: output, shape index: {}]  }
   0x1   :  { %11 = vsyncpa [#allocation7], 0 }
   0x2   :  { %12 = vsyncpa [#allocation10], 0 }
   0x3   :  { %13 = vsyncpa [#allocation5], 0  ;;  %s619_s18 = smov [#allocation6]   ;;  %s620_s20 = smov [#allocation9]  }
   0x4   :  { %s31_s19 = sshll.u32 %s619_s18, 4  ;;  %s53_s21 = sshll.u32 %s620_s20, 4  ;;  %s32_s19 = int_to_ptr.vmem [resolvable:$true] %s31_s19  ;;  %s661_s21 = int_to_ptr.vmem [resolvable:$true] %s53_s21 }
   0x5   :  { %s479_s24 = scalar_lea.hbm %s750_s1, 1024 }
   0x6   :  { %p480_p0 = scmp.ne.s32.totalorder %s750_s1, %s479_s24  ;;  %p483_p1 = scmp.lt.u32.totalorder %s479_s24, %s750_s1 }
   0x8   :  { %p485_p2 = pnand %p483_p1, %p480_p0 }
   0xa   :  { %488 = shalt.err (!%p485_p2)
}
   0xb   :  { %s489_s29 = scalar_lea.vmem %s32_s19, 1024  ;;  %p494_p4 = scmp.lt.s32.totalorder %s32_s19, %s32_s19 }
   0xc   :  { %p490_p3 = scmp.ne.s32.totalorder %s32_s19, %s489_s29  ;;  %p495_p5 = scmp.lt.s32.totalorder %s489_s29, %s489_s29 }
   0xe   :  { %p496_p6 = por %p495_p5, %p494_p4 }
  0x10   :  { %p497_p7 = pnand %p496_p6, %p490_p3 }
  0x12   :  { %500 = shalt.err (!%p497_p7)
}
  0x13   :  { %s621_s30 = smov 64   ;;  %s622_s6 = smov 4  }
  0x14   :  { %37 = dma.hbm_to_vmem [thread:$0]  %s750_s1, 1024, %s32_s19, [#allocation7], %s621_s30, %s621_s30, %s622_s6  }
  0x15   :  { %s501_s11 = scalar_lea.hbm %s752_s3, 1024 }
  0x16   :  { %p502_p8 = scmp.ne.s32.totalorder %s752_s3, %s501_s11  ;;  %p505_p9 = scmp.lt.u32.totalorder %s501_s11, %s752_s3 }
  0x18   :  { %p507_p10 = pnand %p505_p9, %p502_p8 }
  0x1a   :  { %510 = shalt.err (!%p507_p10)
}
  0x1b   :  { %s511_s16 = scalar_lea.vmem %s661_s21, 1024  ;;  %p516_p12 = scmp.lt.s32.totalorder %s661_s21, %s661_s21 }
  0x1c   :  { %p512_p11 = scmp.ne.s32.totalorder %s661_s21, %s511_s16  ;;  %p517_p13 = scmp.lt.s32.totalorder %s511_s16, %s511_s16 }
  0x1e   :  { %p518_p0 = por %p517_p13, %p516_p12 }
  0x20   :  { %p519_p1 = pnand %p518_p0, %p512_p11 }
  0x22   :  { %522 = shalt.err (!%p519_p1)
}
  0x23   :  { %59 = dma.hbm_to_vmem [thread:$0]  %s752_s3, 1024, %s661_s21, [#allocation10], %s621_s30, %s621_s30, %s622_s6  }
  0x24   :  { %s623_s18 = smov [#allocation3]   ;;  %s624_s20 = smov [#allocation8]  }
  0x25   :  { %s19_s19 = sshll.u32 %s623_s18, 4  ;;  %s44_s22 = sshll.u32 %s624_s20, 4  ;;  %s20_s19 = int_to_ptr.vmem [resolvable:$true] %s19_s19  ;;  %s45_s22 = int_to_ptr.vmem [resolvable:$true] %s44_s22 }
  0x26   :  { %s523_s25 = scalar_lea.hbm %s749_s0, 128 }
  0x27   :  { %p524_p2 = scmp.ne.s32.totalorder %s749_s0, %s523_s25  ;;  %p527_p3 = scmp.lt.u32.totalorder %s523_s25, %s749_s0 }
  0x29   :  { %p529_p4 = pnand %p527_p3, %p524_p2 }
  0x2b   :  { %532 = shalt.err (!%p529_p4)
}
  0x2c   :  { %s533_s3 = scalar_lea.vmem %s20_s19, 128  ;;  %p538_p6 = scmp.lt.s32.totalorder %s20_s19, %s20_s19 }
  0x2d   :  { %p534_p5 = scmp.ne.s32.totalorder %s20_s19, %s533_s3  ;;  %p539_p7 = scmp.lt.s32.totalorder %s533_s3, %s533_s3 }
  0x2f   :  { %p540_p8 = por %p539_p7, %p538_p6 }
  0x31   :  { %p541_p9 = pnand %p540_p8, %p534_p5 }
  0x33   :  { %544 = shalt.err (!%p541_p9)
}
  0x34   :  { %25 = dma.hbm_to_vmem [thread:$0]  %s749_s0, 128, %s20_s19, [#allocation4], %s621_s30, %s621_s30, %s622_s6  }
  0x35   :  { %s545_s10 = scalar_lea.hbm %s751_s2, 16 }
  0x36   :  { %p546_p10 = scmp.ne.s32.totalorder %s751_s2, %s545_s10  ;;  %p549_p11 = scmp.lt.u32.totalorder %s545_s10, %s751_s2 }
  0x38   :  { %p551_p12 = pnand %p549_p11, %p546_p10 }
  0x3a   :  { %554 = shalt.err (!%p551_p12)
}
  0x3b   :  { %s555_s15 = scalar_lea.vmem %s45_s22, 16  ;;  %s559_s16 = scalar_lea.vmem %s45_s22, 32 }
  0x3c   :  { %p556_p13 = scmp.ne.s32.totalorder %s45_s22, %s555_s15  ;;  %p560_p0 = scmp.lt.s32.totalorder %s45_s22, %s45_s22 }
  0x3d   :  { %p561_p1 = scmp.lt.s32.totalorder %s559_s16, %s555_s15 }
  0x3f   :  { %p562_p2 = por %p561_p1, %p560_p0 }
  0x41   :  { %p563_p3 = pnand %p562_p2, %p556_p13 }
  0x43   :  { %566 = shalt.err (!%p563_p3)
}
  0x44   :  { %47 = dma.hbm_to_vmem [thread:$0]  %s751_s2, 16, %s45_s22, [#allocation7]  }
  0x45   :  { %s625_s6 = smov [#allocation11]   ;;  %s567_s19 = scalar_lea.hbm %s753_s4, 16 }
  0x46   :  { %s66_s1 = sshll.u32 %s625_s6, 4  ;;  %p568_p4 = scmp.ne.s32.totalorder %s753_s4, %s567_s19  ;;  %s67_s1 = int_to_ptr.vmem [resolvable:$true] %s66_s1 }
  0x47   :  { %p571_p5 = scmp.lt.u32.totalorder %s567_s19, %s753_s4 }
  0x49   :  { %p573_p6 = pnand %p571_p5, %p568_p4 }
  0x4b   :  { %576 = shalt.err (!%p573_p6)
}
  0x4c   :  { %s577_s26 = scalar_lea.vmem %s67_s1, 16  ;;  %s581_s2 = scalar_lea.vmem %s67_s1, 32 }
  0x4d   :  { %p578_p7 = scmp.ne.s32.totalorder %s67_s1, %s577_s26  ;;  %p582_p8 = scmp.lt.s32.totalorder %s67_s1, %s67_s1 }
  0x4e   :  { %p583_p9 = scmp.lt.s32.totalorder %s581_s2, %s577_s26 }
  0x50   :  { %p584_p10 = por %p583_p9, %p582_p8 }
  0x52   :  { %p585_p11 = pnand %p584_p10, %p578_p7 }
  0x54   :  { %588 = shalt.err (!%p585_p11)
}
  0x55   :  { %69 = dma.hbm_to_vmem [thread:$0]  %s753_s4, 16, %s67_s1, [#allocation10]  }
  0x56   :  { %611 = dma.done.wait [#allocation4], 128  }
  0x57   :  { %612 = vsyncadd [#allocation4], 4294967168 }
  0x58   :  { %613 = dma.done.wait [#allocation7], 1040  }
  0x59   :  { %614 = vsyncadd [#allocation7], 4294966256 }
  0x5a   :  { %615 = dma.done.wait [#allocation10], 1040  }
  0x5b   :  { %616 = vsyncadd [#allocation10], 4294966256  ;;  %v626_v0 = vmov 0.0   ;;  %vm627_vm0 = vmmov 0   ;;  %v458_v1 = vld [vmem:[#allocation6] sm:$0xff]   ;;  %v459_v2 = vld [vmem:[#allocation6 + $0x8] sm:$0xff]  }
  0x5c   :  { %406 = vmatprep.subr.bf16.mxu0 %v626_v0  ;;  %422 = vmatprep.mubr.msk.bf16.mxu0 %vm627_vm0, %v626_v0  ;;  %v460_v3 = vld [vmem:[#allocation6 + $0x10] sm:$0xff]   ;;  %v467_v4 = vld [vmem:[#allocation9] sm:$0xff]   ;;  %v461_v5 = vld [vmem:[#allocation6 + $0x18] sm:$0xff]   ;;  %s628_s4 = smov [#allocation12]  }
  0x5d   :  { %426 = vmatprep.subr.bf16.mxu1 %v626_v0  ;;  %442 = vmatprep.mubr.msk.bf16.mxu1 %vm627_vm0, %v626_v0  ;;  %v468_v6 = vld [vmem:[#allocation9 + $0x8] sm:$0xff]   ;;  %v462_v7 = vld [vmem:[#allocation6 + $0x20] sm:$0xff]   ;;  %v465_v10 = vld [vmem:[#allocation6 + $0x38] sm:$0xff]   ;;  %s355_s28 = sshll.u32 %s628_s4, 4  ;;  %s356_s28 = int_to_ptr.vmem [resolvable:$true] %s355_s28 }
  0x5e   :  { %407 = vmatpush3.bf16.msra.mxu0 %v458_v1  ;;  %427 = vmatpush3.bf16.msra.mxu1 %v467_v4  ;;  %v463_v8 = vld [vmem:[#allocation6 + $0x28] sm:$0xff]   ;;  %v464_v9 = vld [vmem:[#allocation6 + $0x30] sm:$0xff]   ;;  %v466_v11 = vld [vmem:[#allocation3] sm:$0xff]   ;;  %s589_s29 = scalar_lea.vmem %s356_s28, 256  ;;  %p594_p13 = scmp.lt.s32.totalorder %s356_s28, %s356_s28 }
  0x5f   :  { %408 = vmatprep.subr.bf16.mxu0 %v626_v0  ;;  %428 = vmatprep.subr.bf16.mxu1 %v626_v0  ;;  %v469_v12 = vld [vmem:[#allocation9 + $0x10] sm:$0xff]   ;;  %v470_v13 = vld [vmem:[#allocation9 + $0x18] sm:$0xff]   ;;  %v471_v14 = vld [vmem:[#allocation9 + $0x20] sm:$0xff]   ;;  %p590_p12 = scmp.ne.s32.totalorder %s356_s28, %s589_s29  ;;  %p595_p0 = scmp.lt.s32.totalorder %s589_s29, %s589_s29 }
  0x60   :  { %v472_v15 = vld [vmem:[#allocation9 + $0x28] sm:$0xff]   ;;  %v473_v16 = vld [vmem:[#allocation9 + $0x30] sm:$0xff]   ;;  %v474_v17 = vld [vmem:[#allocation9 + $0x38] sm:$0xff]  }
  0x61   :  { %v369_v18 = vld [vmem:[#allocation8] ss:$0 sm:$0xff]  ;;  %v387_v36 = vld [vmem:[#allocation11] ss:$0 sm:$0xff]  ;;  %p596_p1 = por %p595_p0, %p594_p13 }
  0x62   :  { %409 = vmatpush3.bf16.msra.mxu0 %v459_v2  ;;  %429 = vmatpush3.bf16.msra.mxu1 %v468_v6 }
  0x63   :  { %410 = vmatprep.subr.bf16.mxu0 %v626_v0  ;;  %430 = vmatprep.subr.bf16.mxu1 %v626_v0  ;;  %p597_p2 = pnand %p596_p1, %p590_p12 }
  0x66   :  { %411 = vmatpush3.bf16.msra.mxu0 %v460_v3  ;;  %431 = vmatpush3.bf16.msra.mxu1 %v469_v12 }
  0x67   :  { %412 = vmatprep.subr.bf16.mxu0 %v626_v0  ;;  %432 = vmatprep.subr.bf16.mxu1 %v626_v0 }
  0x6a   :  { %413 = vmatpush3.bf16.msra.mxu0 %v461_v5  ;;  %433 = vmatpush3.bf16.msra.mxu1 %v470_v13 }
  0x6b   :  { %414 = vmatprep.subr.bf16.mxu0 %v626_v0  ;;  %434 = vmatprep.subr.bf16.mxu1 %v626_v0 }
  0x6e   :  { %415 = vmatpush3.bf16.msra.mxu0 %v462_v7  ;;  %435 = vmatpush3.bf16.msra.mxu1 %v471_v14 }
  0x6f   :  { %416 = vmatprep.subr.bf16.mxu0 %v626_v0  ;;  %436 = vmatprep.subr.bf16.mxu1 %v626_v0 }
  0x72   :  { %417 = vmatpush3.bf16.msra.mxu0 %v463_v8  ;;  %437 = vmatpush3.bf16.msra.mxu1 %v472_v15 }
  0x73   :  { %418 = vmatprep.subr.bf16.mxu0 %v626_v0  ;;  %438 = vmatprep.subr.bf16.mxu1 %v626_v0 }
  0x76   :  { %419 = vmatpush3.bf16.msra.mxu0 %v464_v9  ;;  %439 = vmatpush3.bf16.msra.mxu1 %v473_v16 }
  0x77   :  { %420 = vmatprep.subr.bf16.mxu0 %v626_v0  ;;  %440 = vmatprep.subr.bf16.mxu1 %v626_v0 }
  0x7a   :  { %421 = vmatpush3.bf16.msra.mxu0 %v465_v10  ;;  %441 = vmatpush3.bf16.msra.mxu1 %v474_v17 }
  0x7d   :  { %423 = vmatmul.mubr.bf16.vlgmr.msra.gmra.mrb[0].mxu0 %v466_v11 }
 0x150   :  { %v205_v19 = vpop.f32.mrb[0].mxu0 }
 0x151   :  { %v206_v20 = vadd.f32 %v369_v18, %v205_v19  ;;  %v424_v21 = vpop.f32.mrb[1].mxu0 }
 0x152   :  { %v208_v22 = vpop.f32.mrb[2].mxu0 }
 0x153   :  { %v214_v23 = vmul.f32 0.70710677, %v206_v20  ;;  %v209_v24 = vadd.f32 %v369_v18, %v208_v22  ;;  %v425_v25 = vpop.f32.mrb[3].mxu0  ;;  %v212_v30 = vmul.f32 0.5, %v206_v20 }
 0x155   :  { %475 = verf.f32 %v214_v23  ;;  %v215_v26 = vmul.f32 0.70710677, %v209_v24  ;;  %v213_v31 = vmul.f32 0.5, %v209_v24 }
 0x157   :  { %477 = verf.f32 %v215_v26 }
 0x15f   :  { %v476_v27 = vpop.eup %475 }
 0x160   :  { %v218_v28 = vadd.f32 1.0, %v476_v27 }
 0x161   :  { %v478_v29 = vpop.eup %477 }
 0x162   :  { %v219_v32 = vadd.f32 1.0, %v478_v29  ;;  %v220_v33 = vmul.f32 %v218_v28, %v212_v30 }
 0x164   :  { %v221_v34 = vmul.f32 %v219_v32, %v213_v31 }
 0x166   :  { %v224_v35 = vpack.c.bf16 %v221_v34, %v220_v33 }
 0x168   :  { %443 = vmatmul.mubr.bf16.vlgmr.msra.gmra.mrb[0].mxu1 %v224_v35 }
 0x23b   :  { %v323_v37 = vpop.f32.mrb[0].mxu1 }
 0x23c   :  { %v346_v38 = vadd.f32 %v387_v36, %v323_v37  ;;  %v444_v39 = vpop.f32.mrb[1].mxu1 }
 0x23d   :  { %v326_v40 = vpop.f32.mrb[2].mxu1 }
 0x23e   :  { %348 = vst [vmem:[#allocation12] sm:$0xff] %v346_v38  ;;  %v347_v41 = vadd.f32 %v387_v36, %v326_v40  ;;  %v445_v42 = vpop.f32.mrb[3].mxu1 }
 0x240   :  { %349 = vst [vmem:[#allocation12 + $0x8] sm:$0xff] %v347_v41 }
 0x241   :  { %600 = shalt.err (!%p597_p2)
}
 0x242   :  { %s601_s7 = scalar_lea.hbm %s754_s5, 256 }
 0x243   :  { %p602_p3 = scmp.ne.s32.totalorder %s754_s5, %s601_s7  ;;  %p605_p4 = scmp.lt.u32.totalorder %s601_s7, %s754_s5 }
 0x245   :  { %p607_p5 = pnand %p605_p4, %p602_p3 }
 0x247   :  { %610 = shalt.err (!%p607_p5)
}
 0x248   :  { %s629_s12 = smov 128   ;;  %s630_s13 = smov 8  }
 0x249   :  { %361 = dma.vmem_to_hbm [thread:$0]  %s356_s28, 256, %s754_s5, [#allocation5], %s629_s12, %s629_s12, %s630_s13  }
 0x24a   :  { %617 = dma.done.wait [#allocation5], 256  }
 0x24b   :  { %618 = vsyncadd [#allocation5], 4294967040 }
 0x24c   :  { %365 = vsyncpa [#allocation4], 1 }
 0x24d   :  { %366 = vsyncpa [#allocation7], 1 }
 0x24e   :  { %367 = vsyncpa [#allocation10], 1 }
 0x24f   :  { %368 = vsyncpa [#allocation5], 1 }

</bundles_post_ra>
